<compile_context>
chip_gen: v7x
topology: tpu7x:2x2x1
jax: 0.10.0
libtpu: 0.0.40
codegen_flags: <defaults>
</compile_context>

<pallas_src>
import jax
import jax.numpy as jnp
from jax.experimental import pallas as pl
from jax.experimental.pallas import tpu as pltpu

# ---------------------------------------------------------------------------
# Model dimensions (consistent with an x of shape [2, 4, 16, 16])
# ---------------------------------------------------------------------------
B = 2
C, H, W = 4, 16, 16
D_IN = C * H * W          # 1024
D_HID = 128               # encoder / decoder hidden width
D_LAT = 32                # latent dimension
ENC_OUT = 128             # lane-padded fused head: [mu | logvar | zeros]


def _pick_tb(batch):
    """Batch-tile height.

    Full batch when small (block shape == full array dim is always legal);
    for large batches pick an MXU-height, sublane-friendly tile (multiple of
    16 so both f32 and bf16 outputs tile cleanly) that divides the batch.
    """
    if batch <= 256:
        return batch
    for tb in (256, 128, 64, 32, 16):
        if batch % tb == 0:
            return tb
    # TODO(synk): ragged batches would need a masked tail tile; fall back to
    # one full-height block for now.
    return batch


def vae_kernel(
    x_ref, eps_ref,
    w1q_ref, s1_ref, b1_ref,
    wenc_ref, benc_ref,
    wd1_ref, bd1_ref,
    wd2q_ref, s2_ref, bd2_ref,
    recon_ref, musig_ref,
):
    # ----- encoder layer 1 (int8 weights; dequant scale folded in after dot) --
    x = x_ref[...].astype(jnp.bfloat16)              # in-kernel cast (VPU, hidden)
    w1 = w1q_ref[...].astype(jnp.bfloat16)           # int8 -> bf16 dequant values
    h = jnp.dot(x, w1, preferred_element_type=jnp.float32)
    h = jnp.maximum(h * s1_ref[...] + b1_ref[...], 0.0)          # scale+bias+ReLU

    # ----- fused (mu | logvar) head, padded to 128 lanes (f32 for precision) --
    # columns: [0:D_LAT) = mu, [D_LAT:2*D_LAT) = logvar, rest = 0
    enc = jnp.dot(h, wenc_ref[...], preferred_element_type=jnp.float32) + benc_ref[...]

    lane = jax.lax.broadcasted_iota(jnp.int32, enc.shape, 1)
    sig = jnp.exp(0.5 * enc)                          # EUP; sigma on logvar lanes

    # Packed lane-dense output slab: [mu | sigma | 0]; split in the wrapper.
    musig_ref[...] = jnp.where(
        lane < D_LAT, enc,
        jnp.where(lane < 2 * D_LAT, sig, 0.0)).astype(musig_ref.dtype)

    # Reparameterization without any lane slicing:
    #   zz = [mu | sigma*eps | 0]   (eps is pre-padded onto the logvar lanes)
    #   zz @ [wd1; wd1; 0] == (mu + sigma*eps) @ wd1 == z @ wd1
    zz = jnp.where(lane < D_LAT, enc, sig * eps_ref[...])

    # ----- decoder -----
    hd = jnp.dot(zz.astype(jnp.bfloat16), wd1_ref[...],
                 preferred_element_type=jnp.float32) + bd1_ref[...]
    hd = jnp.maximum(hd, 0.0)

    w2 = wd2q_ref[...].astype(jnp.bfloat16)           # int8 -> bf16 dequant values
    logits = jnp.dot(hd.astype(jnp.bfloat16), w2,
                     preferred_element_type=jnp.float32)
    logits = logits * s2_ref[...] + bd2_ref[...]
    recon_ref[...] = jax.nn.sigmoid(logits).astype(recon_ref.dtype)


def _cost_estimate(batch):
    flops = 2 * batch * (D_IN * D_HID + D_HID * ENC_OUT
                         + ENC_OUT * D_HID + D_HID * D_IN)
    transcendentals = batch * (ENC_OUT + D_IN)        # exp (sigma) + sigmoid
    weight_bytes = (D_IN * D_HID                      # w1  (int8)
                    + D_HID * ENC_OUT * 4             # wenc (f32)
                    + ENC_OUT * D_HID * 2             # wd1x2 (bf16)
                    + D_HID * D_IN)                   # wd2 (int8)
    scale_bias_bytes = 4 * (2 * D_HID + ENC_OUT + D_HID + 2 * D_IN)
    act_bytes = 4 * batch * (D_IN + ENC_OUT)          # x + padded eps (f32)
    out_bytes = batch * (2 * D_IN + 4 * ENC_OUT)      # recon bf16 + musig f32
    return pl.CostEstimate(flops=flops, transcendentals=transcendentals,
                           bytes_accessed=weight_bytes + scale_bias_bytes
                           + act_bytes + out_bytes)


def vae_forward(x_nchw, eps, params):
    """x_nchw: [B, C, H, W] float32 (PyTorch NCHW convention).
    Returns (recon [B, C, H, W] bf16, mu [B, D_LAT] f32, sigma [B, D_LAT] f32)."""
    bx = x_nchw.shape[0]
    x2d = x_nchw.reshape(bx, D_IN)         # free view; bf16 cast happens in-kernel

    # eps (bx, D_LAT) -> (bx, ENC_OUT) with the noise on the logvar lanes so the
    # kernel never has to shift lanes (tiny one-off pad, ~bx*0.5 KiB).
    eps_pad = jnp.pad(eps.astype(jnp.float32),
                      ((0, 0), (D_LAT, ENC_OUT - 2 * D_LAT)))

    tb = _pick_tb(bx)
    n_tiles = pl.cdiv(bx, tb)

    def resident(shape):
        # Weights / scales / biases: block index is constant -> DMA'd once and
        # reused across every batch tile.  (With a single grid step they are
        # fetched exactly once regardless; for scaled-up configs consider
        # pipeline_mode=pl.Buffered(1) to drop the unused second buffer.)
        return pl.BlockSpec(shape, lambda i: (0, 0))

    grid_spec = pltpu.PrefetchScalarGridSpec(
        num_scalar_prefetch=0,
        grid=(n_tiles,),
        in_specs=[
            pl.BlockSpec((tb, D_IN), lambda i: (i, 0)),       # x tile (f32)
            pl.BlockSpec((tb, ENC_OUT), lambda i: (i, 0)),    # padded eps tile
            resident((D_IN, D_HID)),                          # w1 (int8)
            resident((1, D_HID)),                             # w1 per-col scale
            resident((1, D_HID)),                             # b1
            resident((D_HID, ENC_OUT)),                       # wenc [mu|logvar|0]
            resident((1, ENC_OUT)),                           # benc
            resident((ENC_OUT, D_HID)),                       # [wd1; wd1; 0] bf16
            resident((1, D_HID)),                             # bd1
            resident((D_HID, D_IN)),                          # wd2 (int8)
            resident((1, D_IN)),                              # wd2 per-col scale
            resident((1, D_IN)),                              # bd2
        ],
        out_specs=(
            pl.BlockSpec((tb, D_IN), lambda i: (i, 0)),       # recon tile (bf16)
            pl.BlockSpec((tb, ENC_OUT), lambda i: (i, 0)),    # [mu|sigma|0] (f32)
        ),
    )

    recon2d, musig = pl.pallas_call(
        vae_kernel,
        out_shape=(
            jax.ShapeDtypeStruct((bx, D_IN), jnp.bfloat16),
            jax.ShapeDtypeStruct((bx, ENC_OUT), jnp.float32),
        ),
        grid_spec=grid_spec,
        cost_estimate=_cost_estimate(bx),
        compiler_params=pltpu.CompilerParams(
            dimension_semantics=("parallel",)),   # splits batch tiles across v7x TCs
    )(
        x2d, eps_pad,
        params["w1q"], params["s1"], params["b1"],
        params["wenc"], params["benc"],
        params["wd1x2"], params["bd1"],
        params["wd2q"], params["s2"], params["bd2"],
    )

    mu = musig[:, :D_LAT]
    sigma = musig[:, D_LAT:2 * D_LAT]
    # recon stays bf16 (downstream losses tolerate it); cast here if f32 needed.
    return recon2d.reshape(bx, C, H, W), mu, sigma


def init_params(key):
    """Deterministic synthetic parameter init (Glorot-ish scaling)."""
    ks = jax.random.split(key, 5)

    def dense(k, fan_in, fan_out):
        scale = 1.0 / jnp.sqrt(jnp.float32(fan_in))
        w = jax.random.normal(k, (fan_in, fan_out), jnp.float32) * scale
        b = jnp.zeros((1, fan_out), jnp.float32)      # kept 2D for TPU layout
        return w, b

    def quant_int8(w):
        # Per-output-column symmetric int8; the scale factors out of the matmul
        # so it is applied once to the f32 accumulator inside the kernel.
        amax = jnp.max(jnp.abs(w), axis=0, keepdims=True)
        s = jnp.where(amax > 0, amax / 127.0, 1.0).astype(jnp.float32)
        wq = jnp.round(w / s).astype(jnp.int8)
        return wq, s

    w1, b1 = dense(ks[0], D_IN, D_HID)
    wmu, bmu = dense(ks[1], D_HID, D_LAT)
    wlv, blv = dense(ks[2], D_HID, D_LAT)
    wd1, bd1 = dense(ks[3], D_LAT, D_HID)
    wd2, bd2 = dense(ks[4], D_HID, D_IN)

    # int8 storage for the two big matrices (~93% of weight bytes -> ~2x less
    # weight DMA).  The kernel dequantizes to bf16 before the MXU.
    # TODO(synk): on v5e/v6e these could feed the MXU's native int8 path, and
    # on v7x an fp8 (e4m3) format would be the native choice; the bf16-dequant
    # path used here already captures the HBM-byte win on all generations.
    w1q, s1 = quant_int8(w1)
    wd2q, s2 = quant_int8(wd2)

    # Fused + lane-padded encoder head: [mu | logvar | zeros] -> 128 lanes,
    # kept in f32 (tiny) so mu / sigma = exp(0.5*logvar) stay accurate.
    pad = ENC_OUT - 2 * D_LAT
    wenc = jnp.concatenate(
        [wmu, wlv, jnp.zeros((D_HID, pad), jnp.float32)], axis=1)
    benc = jnp.concatenate(
        [bmu, blv, jnp.zeros((1, pad), jnp.float32)], axis=1)

    # Row-duplicated decoder weight: [wd1; wd1; 0] so that
    # [mu | sigma*eps | 0] @ wd1x2 == (mu + sigma*eps) @ wd1 (no lane shifts).
    wd1x2 = jnp.concatenate(
        [wd1, wd1, jnp.zeros((pad, D_HID), jnp.float32)], axis=0
    ).astype(jnp.bfloat16)

    return dict(w1q=w1q, s1=s1, b1=b1, wenc=wenc, benc=benc,
                wd1x2=wd1x2, bd1=bd1, wd2q=wd2q, s2=s2, bd2=bd2)


if __name__ == "__main__":
    key = jax.random.PRNGKey(0)
    k_param, k_x, k_eps = jax.random.split(key, 3)

    params = init_params(k_param)
    x = jax.random.uniform(k_x, (B, C, H, W), jnp.float32)      # NCHW input
    eps = jax.random.normal(k_eps, (B, D_LAT), jnp.float32)     # reparam noise

    recon, mu, sigma = jax.jit(vae_forward)(x, eps, params)
    jax.block_until_ready((recon, mu, sigma))

    assert recon.shape == (B, C, H, W)
    assert mu.shape == (B, D_LAT)
    assert sigma.shape == (B, D_LAT)
    assert bool(jnp.all(jnp.isfinite(recon.astype(jnp.float32))))
    assert bool(jnp.all((recon >= 0.0) & (recon <= 1.0)))
    assert bool(jnp.all(sigma > 0))

    print("KERNEL_OK")
</pallas_src>

<mosaic_0001>
module attributes {stable_mosaic.version = 11 : i64} {
  func.func @vae_kernel(%arg0: i32, %arg1: memref<2x1024xf32, #tpu.memory_space<vmem>>, %arg2: memref<2x128xf32, #tpu.memory_space<vmem>>, %arg3: memref<1024x128xi8, #tpu.memory_space<vmem>>, %arg4: memref<1x128xf32, #tpu.memory_space<vmem>>, %arg5: memref<1x128xf32, #tpu.memory_space<vmem>>, %arg6: memref<128x128xf32, #tpu.memory_space<vmem>>, %arg7: memref<1x128xf32, #tpu.memory_space<vmem>>, %arg8: memref<128x128xbf16, #tpu.memory_space<vmem>>, %arg9: memref<1x128xf32, #tpu.memory_space<vmem>>, %arg10: memref<128x1024xi8, #tpu.memory_space<vmem>>, %arg11: memref<1x1024xf32, #tpu.memory_space<vmem>>, %arg12: memref<1x1024xf32, #tpu.memory_space<vmem>>, %arg13: memref<2x1024xbf16, #tpu.memory_space<vmem>>, %arg14: memref<2x128xf32, #tpu.memory_space<vmem>>) attributes {dimension_semantics = [#tpu.dimension_semantics<parallel>], iteration_bounds = array<i64: 1>, scalar_prefetch = 0 : i64, scratch_operands = 0 : i64, tpu.core_type = #tpu.core_type<tc>, window_params = [{transform_indices = @transform_0, window_bounds = array<i64: 2, 1024>}, {transform_indices = @transform_1, window_bounds = array<i64: 2, 128>}, {pipeline_mode = #tpu.pipeline_mode<synchronous>, transform_indices = @transform_2, window_bounds = array<i64: 1024, 128>}, {pipeline_mode = #tpu.pipeline_mode<synchronous>, transform_indices = @transform_3, window_bounds = array<i64: 1, 128>}, {pipeline_mode = #tpu.pipeline_mode<synchronous>, transform_indices = @transform_4, window_bounds = array<i64: 1, 128>}, {pipeline_mode = #tpu.pipeline_mode<synchronous>, transform_indices = @transform_5, window_bounds = array<i64: 128, 128>}, {pipeline_mode = #tpu.pipeline_mode<synchronous>, transform_indices = @transform_6, window_bounds = array<i64: 1, 128>}, {pipeline_mode = #tpu.pipeline_mode<synchronous>, transform_indices = @transform_7, window_bounds = array<i64: 128, 128>}, {pipeline_mode = #tpu.pipeline_mode<synchronous>, transform_indices = @transform_8, window_bounds = array<i64: 1, 128>}, {pipeline_mode = #tpu.pipeline_mode<synchronous>, transform_indices = @transform_9, window_bounds = array<i64: 128, 1024>}, {pipeline_mode = #tpu.pipeline_mode<synchronous>, transform_indices = @transform_10, window_bounds = array<i64: 1, 1024>}, {pipeline_mode = #tpu.pipeline_mode<synchronous>, transform_indices = @transform_11, window_bounds = array<i64: 1, 1024>}, {transform_indices = @transform_12, window_bounds = array<i64: 2, 1024>}, {transform_indices = @transform_13, window_bounds = array<i64: 2, 128>}]} {
    %c0 = arith.constant 0 : index
    %c0_0 = arith.constant 0 : index
    %0 = vector.load %arg1[%c0, %c0_0] : memref<2x1024xf32, #tpu.memory_space<vmem>>, vector<2x1024xf32>
    %1 = arith.truncf %0 : vector<2x1024xf32> to vector<2x1024xbf16>
    %c0_1 = arith.constant 0 : index
    %c0_2 = arith.constant 0 : index
    %2 = vector.load %arg3[%c0_1, %c0_2] : memref<1024x128xi8, #tpu.memory_space<vmem>>, vector<1024x128xi8>
    %3 = arith.sitofp %2 : vector<1024x128xi8> to vector<1024x128xbf16>
    %cst = arith.constant dense<0.000000e+00> : vector<2x128xf32>
    %4 = tpu.matmul %1, %3, %cst {dimension_numbers = #tpu.dot_dimension_numbers<[1], [0], [0], [1], [0, 0, 1, 1], [], []>} : vector<2x1024xbf16>, vector<1024x128xbf16>, vector<2x128xf32> -> vector<2x128xf32>
    %c0_3 = arith.constant 0 : index
    %c0_4 = arith.constant 0 : index
    %5 = vector.load %arg4[%c0_3, %c0_4] : memref<1x128xf32, #tpu.memory_space<vmem>>, vector<1x128xf32>
    %6 = vector.broadcast %5 : vector<1x128xf32> to vector<2x128xf32>
    %7 = arith.mulf %4, %6 : vector<2x128xf32>
    %c0_5 = arith.constant 0 : index
    %c0_6 = arith.constant 0 : index
    %8 = vector.load %arg5[%c0_5, %c0_6] : memref<1x128xf32, #tpu.memory_space<vmem>>, vector<1x128xf32>
    %9 = vector.broadcast %8 : vector<1x128xf32> to vector<2x128xf32>
    %10 = arith.addf %7, %9 : vector<2x128xf32>
    %cst_7 = arith.constant 0.000000e+00 : f32
    %11 = vector.broadcast %cst_7 : f32 to vector<2x128xf32>
    %12 = arith.maximumf %10, %11 : vector<2x128xf32>
    %c0_8 = arith.constant 0 : index
    %c0_9 = arith.constant 0 : index
    %13 = vector.load %arg6[%c0_8, %c0_9] : memref<128x128xf32, #tpu.memory_space<vmem>>, vector<128x128xf32>
    %cst_10 = arith.constant dense<0.000000e+00> : vector<2x128xf32>
    %14 = tpu.matmul %12, %13, %cst_10 {dimension_numbers = #tpu.dot_dimension_numbers<[1], [0], [0], [1], [0, 0, 1, 1], [], []>} : vector<2x128xf32>, vector<128x128xf32>, vector<2x128xf32> -> vector<2x128xf32>
    %c0_11 = arith.constant 0 : index
    %c0_12 = arith.constant 0 : index
    %15 = vector.load %arg7[%c0_11, %c0_12] : memref<1x128xf32, #tpu.memory_space<vmem>>, vector<1x128xf32>
    %16 = vector.broadcast %15 : vector<1x128xf32> to vector<2x128xf32>
    %17 = arith.addf %14, %16 : vector<2x128xf32>
    %18 = tpu.iota {dimensions = array<i32: 1>} : vector<2x128xi32>
    %cst_13 = arith.constant 5.000000e-01 : f32
    %19 = vector.broadcast %cst_13 : f32 to vector<2x128xf32>
    %20 = arith.mulf %19, %17 : vector<2x128xf32>
    %21 = math.exp %20 : vector<2x128xf32>
    %c32_i32 = arith.constant 32 : i32
    %22 = vector.broadcast %c32_i32 : i32 to vector<2x128xi32>
    %23 = arith.cmpi slt, %18, %22 : vector<2x128xi32>
    %c64_i32 = arith.constant 64 : i32
    %24 = vector.broadcast %c64_i32 : i32 to vector<2x128xi32>
    %25 = arith.cmpi slt, %18, %24 : vector<2x128xi32>
    %cst_14 = arith.constant 0.000000e+00 : f32
    %26 = vector.broadcast %cst_14 : f32 to vector<2x128xf32>
    %27 = arith.select %25, %21, %26 : vector<2x128xi1>, vector<2x128xf32>
    %28 = arith.select %23, %17, %27 : vector<2x128xi1>, vector<2x128xf32>
    %c0_15 = arith.constant 0 : index
    %c0_16 = arith.constant 0 : index
    %29 = vector.load %arg14[%c0_15, %c0_16] : memref<2x128xf32, #tpu.memory_space<vmem>>, vector<2x128xf32>
    tpu.vector_store %arg14[%c0_15, %c0_16], %28 {strides = array<i32>} : memref<2x128xf32, #tpu.memory_space<vmem>>, vector<2x128xf32>,
    %c32_i32_17 = arith.constant 32 : i32
    %30 = vector.broadcast %c32_i32_17 : i32 to vector<2x128xi32>
    %31 = arith.cmpi slt, %18, %30 : vector<2x128xi32>
    %c0_18 = arith.constant 0 : index
    %c0_19 = arith.constant 0 : index
    %32 = vector.load %arg2[%c0_18, %c0_19] : memref<2x128xf32, #tpu.memory_space<vmem>>, vector<2x128xf32>
    %33 = arith.mulf %21, %32 : vector<2x128xf32>
    %34 = arith.select %31, %17, %33 : vector<2x128xi1>, vector<2x128xf32>
    %35 = arith.truncf %34 : vector<2x128xf32> to vector<2x128xbf16>
    %c0_20 = arith.constant 0 : index
    %c0_21 = arith.constant 0 : index
    %36 = vector.load %arg8[%c0_20, %c0_21] : memref<128x128xbf16, #tpu.memory_space<vmem>>, vector<128x128xbf16>
    %cst_22 = arith.constant dense<0.000000e+00> : vector<2x128xf32>
    %37 = tpu.matmul %35, %36, %cst_22 {dimension_numbers = #tpu.dot_dimension_numbers<[1], [0], [0], [1], [0, 0, 1, 1], [], []>} : vector<2x128xbf16>, vector<128x128xbf16>, vector<2x128xf32> -> vector<2x128xf32>
    %c0_23 = arith.constant 0 : index
    %c0_24 = arith.constant 0 : index
    %38 = vector.load %arg9[%c0_23, %c0_24] : memref<1x128xf32, #tpu.memory_space<vmem>>, vector<1x128xf32>
    %39 = vector.broadcast %38 : vector<1x128xf32> to vector<2x128xf32>
    %40 = arith.addf %37, %39 : vector<2x128xf32>
    %cst_25 = arith.constant 0.000000e+00 : f32
    %41 = vector.broadcast %cst_25 : f32 to vector<2x128xf32>
    %42 = arith.maximumf %40, %41 : vector<2x128xf32>
    %c0_26 = arith.constant 0 : index
    %c0_27 = arith.constant 0 : index
    %43 = vector.load %arg10[%c0_26, %c0_27] : memref<128x1024xi8, #tpu.memory_space<vmem>>, vector<128x1024xi8>
    %44 = arith.sitofp %43 : vector<128x1024xi8> to vector<128x1024xbf16>
    %45 = arith.truncf %42 : vector<2x128xf32> to vector<2x128xbf16>
    %cst_28 = arith.constant dense<0.000000e+00> : vector<2x1024xf32>
    %46 = tpu.matmul %45, %44, %cst_28 {dimension_numbers = #tpu.dot_dimension_numbers<[1], [0], [0], [1], [0, 0, 1, 1], [], []>} : vector<2x128xbf16>, vector<128x1024xbf16>, vector<2x1024xf32> -> vector<2x1024xf32>
    %c0_29 = arith.constant 0 : index
    %c0_30 = arith.constant 0 : index
    %47 = vector.load %arg11[%c0_29, %c0_30] : memref<1x1024xf32, #tpu.memory_space<vmem>>, vector<1x1024xf32>
    %48 = vector.broadcast %47 : vector<1x1024xf32> to vector<2x1024xf32>
    %49 = arith.mulf %46, %48 : vector<2x1024xf32>
    %c0_31 = arith.constant 0 : index
    %c0_32 = arith.constant 0 : index
    %50 = vector.load %arg12[%c0_31, %c0_32] : memref<1x1024xf32, #tpu.memory_space<vmem>>, vector<1x1024xf32>
    %51 = vector.broadcast %50 : vector<1x1024xf32> to vector<2x1024xf32>
    %52 = arith.addf %49, %51 : vector<2x1024xf32>
    %53 = arith.negf %52 : vector<2x1024xf32>
    %54 = math.exp %53 : vector<2x1024xf32>
    %cst_33 = arith.constant 1.000000e+00 : f32
    %55 = vector.broadcast %cst_33 : f32 to vector<2x1024xf32>
    %56 = arith.addf %55, %54 : vector<2x1024xf32>
    %57 = arith.divf %55, %56 : vector<2x1024xf32>
    %58 = arith.truncf %57 : vector<2x1024xf32> to vector<2x1024xbf16>
    %c0_34 = arith.constant 0 : index
    %c0_35 = arith.constant 0 : index
    %59 = vector.load %arg13[%c0_34, %c0_35] : memref<2x1024xbf16, #tpu.memory_space<vmem>>, vector<2x1024xbf16>
    tpu.vector_store %arg13[%c0_34, %c0_35], %58 {strides = array<i32>} : memref<2x1024xbf16, #tpu.memory_space<vmem>>, vector<2x1024xbf16>,
    return
  }
  func.func @transform_0(%arg0: i32) -> (i32, i32) {
    %c0_i32 = arith.constant 0 : i32
    %c0_i32_0 = arith.constant 0 : i32
    return %arg0, %c0_i32 : i32, i32
  }
  func.func @transform_1(%arg0: i32) -> (i32, i32) {
    %c0_i32 = arith.constant 0 : i32
    %c0_i32_0 = arith.constant 0 : i32
    return %arg0, %c0_i32 : i32, i32
  }
  func.func @transform_2(%arg0: i32) -> (i32, i32) {
    %c0_i32 = arith.constant 0 : i32
    %c0_i32_0 = arith.constant 0 : i32
    %c0_i32_1 = arith.constant 0 : i32
    return %c0_i32, %c0_i32_0 : i32, i32
  }
  func.func @transform_3(%arg0: i32) -> (i32, i32) {
    %c0_i32 = arith.constant 0 : i32
    %c0_i32_0 = arith.constant 0 : i32
    %c0_i32_1 = arith.constant 0 : i32
    return %c0_i32, %c0_i32_0 : i32, i32
  }
  func.func @transform_4(%arg0: i32) -> (i32, i32) {
    %c0_i32 = arith.constant 0 : i32
    %c0_i32_0 = arith.constant 0 : i32
    %c0_i32_1 = arith.constant 0 : i32
    return %c0_i32, %c0_i32_0 : i32, i32
  }
  func.func @transform_5(%arg0: i32) -> (i32, i32) {
    %c0_i32 = arith.constant 0 : i32
    %c0_i32_0 = arith.constant 0 : i32
    %c0_i32_1 = arith.constant 0 : i32
    return %c0_i32, %c0_i32_0 : i32, i32
  }
  func.func @transform_6(%arg0: i32) -> (i32, i32) {
    %c0_i32 = arith.constant 0 : i32
    %c0_i32_0 = arith.constant 0 : i32
    %c0_i32_1 = arith.constant 0 : i32
    return %c0_i32, %c0_i32_0 : i32, i32
  }
  func.func @transform_7(%arg0: i32) -> (i32, i32) {
    %c0_i32 = arith.constant 0 : i32
    %c0_i32_0 = arith.constant 0 : i32
    %c0_i32_1 = arith.constant 0 : i32
    return %c0_i32, %c0_i32_0 : i32, i32
  }
  func.func @transform_8(%arg0: i32) -> (i32, i32) {
    %c0_i32 = arith.constant 0 : i32
    %c0_i32_0 = arith.constant 0 : i32
    %c0_i32_1 = arith.constant 0 : i32
    return %c0_i32, %c0_i32_0 : i32, i32
  }
  func.func @transform_9(%arg0: i32) -> (i32, i32) {
    %c0_i32 = arith.constant 0 : i32
    %c0_i32_0 = arith.constant 0 : i32
    %c0_i32_1 = arith.constant 0 : i32
    return %c0_i32, %c0_i32_0 : i32, i32
  }
  func.func @transform_10(%arg0: i32) -> (i32, i32) {
    %c0_i32 = arith.constant 0 : i32
    %c0_i32_0 = arith.constant 0 : i32
    %c0_i32_1 = arith.constant 0 : i32
    return %c0_i32, %c0_i32_0 : i32, i32
  }
  func.func @transform_11(%arg0: i32) -> (i32, i32) {
    %c0_i32 = arith.constant 0 : i32
    %c0_i32_0 = arith.constant 0 : i32
    %c0_i32_1 = arith.constant 0 : i32
    return %c0_i32, %c0_i32_0 : i32, i32
  }
  func.func @transform_12(%arg0: i32) -> (i32, i32) {
    %c0_i32 = arith.constant 0 : i32
    %c0_i32_0 = arith.constant 0 : i32
    return %arg0, %c0_i32 : i32, i32
  }
  func.func @transform_13(%arg0: i32) -> (i32, i32) {
    %c0_i32 = arith.constant 0 : i32
    %c0_i32_0 = arith.constant 0 : i32
    return %arg0, %c0_i32 : i32, i32
  }
}

</mosaic_0001>

<bundles_post_ra>
// kernel: vae_forward.1
= control target key start
LH: loop header
LB: loop body
LE: loop exit
PB: predicated region body
PF: predicated region fallthrough
CT: control target
= control target key end

     0   :  { %19 = vsyncpa [#allocation3], 0  ;;  %s1738_s0 = inlined_call_operand.vmem [shape: f32[2,1024], index: 0, kind: input, shape index: {}]   ;;  %s1739_s1 = inlined_call_operand.vmem [shape: f32[2,128], index: 1, kind: input, shape index: {}]   ;;  %s1740_s2 = inlined_call_operand.hbm [shape: s8[1024,128], index: 2, kind: input, shape index: {}]   ;;  %s1741_s3 = inlined_call_operand.vmem [shape: f32[1,128], index: 3, kind: input, shape index: {}]   ;;  %s1742_s4 = inlined_call_operand.vmem [shape: f32[1,128], index: 4, kind: input, shape index: {}]   ;;  %s1743_s5 = inlined_call_operand.vmem [shape: f32[128,128], index: 5, kind: input, shape index: {}]   ;;  %s1744_s6 = inlined_call_operand.vmem [shape: f32[1,128], index: 6, kind: input, shape index: {}]   ;;  %s1745_s7 = inlined_call_operand.hbm [shape: bf16[128,128], index: 7, kind: input, shape index: {}]   ;;  %s1746_s8 = inlined_call_operand.vmem [shape: f32[1,128], index: 8, kind: input, shape index: {}]   ;;  %s1747_s9 = inlined_call_operand.hbm [shape: s8[128,1024], index: 9, kind: input, shape index: {}]   ;;  %s1748_s10 = inlined_call_operand.vmem [shape: f32[1,1024], index: 10, kind: input, shape index: {}]   ;;  %s1749_s11 = inlined_call_operand.vmem [shape: f32[1,1024], index: 11, kind: input, shape index: {}]   ;;  %s1750_s12 = inlined_call_operand.vmem [shape: bf16[2,1024], index: 12, kind: output, shape index: {0}]   ;;  %s1751_s13 = inlined_call_operand.vmem [shape: f32[2,128], index: 13, kind: output, shape index: {1}]  }
   0x1   :  { %20 = vsyncpa [#allocation5], 0  ;;  %s1462_s25 = smov [#allocation4]   ;;  %s1392_s29 = scalar_lea.hbm %s1745_s7, 1024 }
   0x2   :  { %s50_s26 = sshll.u32 %s1462_s25, 4  ;;  %p1393_p0 = scmp.ne.s32.totalorder %s1745_s7, %s1392_s29  ;;  %s51_s26 = int_to_ptr.vmem [resolvable:$true] %s50_s26 }
   0x3   :  { %p1396_p1 = scmp.lt.u32.totalorder %s1392_s29, %s1745_s7 }
   0x5   :  { %p1398_p2 = pnand %p1396_p1, %p1393_p0 }
   0x7   :  { %1401 = shalt.err (!%p1398_p2)
}
   0x8   :  { %s1402_s17 = scalar_lea.vmem %s51_s26, 1024  ;;  %p1407_p4 = scmp.lt.s32.totalorder %s51_s26, %s51_s26 }
   0x9   :  { %p1403_p3 = scmp.ne.s32.totalorder %s51_s26, %s1402_s17  ;;  %p1408_p5 = scmp.lt.s32.totalorder %s1402_s17, %s1402_s17 }
   0xb   :  { %p1409_p6 = por %p1408_p5, %p1407_p4 }
   0xd   :  { %p1410_p7 = pnand %p1409_p6, %p1403_p3 }
   0xf   :  { %1413 = shalt.err (!%p1410_p7)
}
  0x10   :  { %s1463_s18 = smov 64   ;;  %s1464_s19 = smov 4  }
  0x11   :  { %56 = dma.hbm_to_vmem [thread:$0]  %s1745_s7, 1024, %s51_s26, [#allocation5], %s1463_s18, %s1463_s18, %s1464_s19  }
  0x12   :  { %s1465_s22 = smov [#allocation2]   ;;  %s1414_s27 = scalar_lea.hbm %s1740_s2, 4096 }
  0x13   :  { %s30_s23 = sshll.u32 %s1465_s22, 4  ;;  %p1415_p8 = scmp.ne.s32.totalorder %s1740_s2, %s1414_s27  ;;  %s31_s23 = int_to_ptr.vmem [resolvable:$true] %s30_s23 }
  0x14   :  { %p1418_p9 = scmp.lt.u32.totalorder %s1414_s27, %s1740_s2 }
  0x16   :  { %p1420_p10 = pnand %p1418_p9, %p1415_p8 }
  0x18   :  { %1423 = shalt.err (!%p1420_p10)
}
  0x19   :  { %s1424_s15 = scalar_lea.vmem %s31_s23, 4096  ;;  %p1429_p12 = scmp.lt.s32.totalorder %s31_s23, %s31_s23 }
  0x1a   :  { %p1425_p11 = scmp.ne.s32.totalorder %s31_s23, %s1424_s15  ;;  %p1430_p13 = scmp.lt.s32.totalorder %s1424_s15, %s1424_s15 }
  0x1c   :  { %p1431_p0 = por %p1430_p13, %p1429_p12 }
  0x1e   :  { %p1432_p1 = pnand %p1431_p0, %p1425_p11 }
  0x20   :  { %1435 = shalt.err (!%p1432_p1)
}
  0x21   :  { %s1466_s7 = smov 128   ;;  %s1467_s26 = smov 8  }
  0x22   :  { %36 = dma.hbm_to_vmem [thread:$0]  %s1740_s2, 4096, %s31_s23, [#allocation3], %s1466_s7, %s1466_s7, %s1467_s26  }
  0x23   :  { %s1468_s19 = smov [#allocation6]   ;;  %s1436_s24 = scalar_lea.hbm %s1747_s9, 4096 }
  0x24   :  { %s64_s20 = sshll.u32 %s1468_s19, 4  ;;  %p1437_p2 = scmp.ne.s32.totalorder %s1747_s9, %s1436_s24  ;;  %s65_s20 = int_to_ptr.vmem [resolvable:$true] %s64_s20 }
  0x25   :  { %p1440_p3 = scmp.lt.u32.totalorder %s1436_s24, %s1747_s9 }
  0x27   :  { %p1442_p4 = pnand %p1440_p3, %p1437_p2 }
  0x29   :  { %1445 = shalt.err (!%p1442_p4)
}
  0x2a   :  { %s1446_s30 = scalar_lea.vmem %s65_s20, 4096  ;;  %p1451_p6 = scmp.lt.s32.totalorder %s65_s20, %s65_s20 }
  0x2b   :  { %p1447_p5 = scmp.ne.s32.totalorder %s65_s20, %s1446_s30  ;;  %p1452_p7 = scmp.lt.s32.totalorder %s1446_s30, %s1446_s30 }
  0x2d   :  { %p1453_p8 = por %p1452_p7, %p1451_p6 }
  0x2f   :  { %p1454_p9 = pnand %p1453_p8, %p1447_p5 }
  0x31   :  { %1457 = shalt.err (!%p1454_p9)
}
  0x32   :  { %s1469_s2 = smov 1024  }
  0x33   :  { %70 = dma.hbm_to_vmem [thread:$0]  %s1747_s9, 4096, %s65_s20, [#allocation5], %s1469_s2, %s1469_s2, %s1463_s18  }
  0x34   :  { %1458 = dma.done.wait [#allocation3], 4096  }
  0x35   :  { %1459 = vsyncadd [#allocation3], 4294963200 }
  0x36   :  { %1460 = dma.done.wait [#allocation5], 5120  }
  0x37   :  { %1461 = vsyncadd [#allocation5], 4294962176  ;;  %v1470_v0 = vmov 1983009808   ;;  %v93_v2 = vlaneseq  ;;  %v143_v3 = vld [vmem:[#allocation2 + $0x20] sm:$0xff]  ;;  %v144_v15 = vld [vmem:[#allocation2 + $0x28] sm:$0xff] }
  0x38   :  { %v91_v1 = vunpack.c.l.s4 %v1470_v0  ;;  %v151_v4 = vld [vmem:[#allocation2 + $0x60] sm:$0xff]  ;;  %v179_v8 = vunpack.c.l.s8.bf16 %v143_v3  ;;  %v180_v9 = vunpack.c.h.s8.bf16 %v143_v3  ;;  %v152_v16 = vld [vmem:[#allocation2 + $0x68] sm:$0xff]  ;;  %v181_v19 = vunpack.c.l.s8.bf16 %v144_v15  ;;  %v145_v31 = vld [vmem:[#allocation2 + $0x30] sm:$0xff] }
  0x39   :  { %v139_v5 = vld [vmem:[#allocation2] sm:$0xff]  ;;  %v1586_v7 = vshrl.u32 %v93_v2, 7  ;;  %v195_v10 = vunpack.c.l.s8.bf16 %v151_v4  ;;  %v196_v11 = vunpack.c.h.s8.bf16 %v151_v4  ;;  %v197_v20 = vunpack.c.l.s8.bf16 %v152_v16  ;;  %v140_v21 = vld [vmem:[#allocation2 + $0x8] sm:$0xff]  ;;  %v153_v32 = vld [vmem:[#allocation2 + $0x70] sm:$0xff] }
  0x3a   :  { %v92_v6 = vunpack.c.0.s8 %v91_v1  ;;  %v147_v12 = vld [vmem:[#allocation2 + $0x40] sm:$0xff]  ;;  %v171_v13 = vunpack.c.l.s8.bf16 %v139_v5  ;;  %1141 = vmatprep.subr.bf16.mxu0 %v179_v8  ;;  %v172_v17 = vunpack.c.h.s8.bf16 %v139_v5  ;;  %v148_v22 = vld [vmem:[#allocation2 + $0x48] sm:$0xff]  ;;  %v173_v25 = vunpack.c.l.s8.bf16 %v140_v21  ;;  %v141_v33 = vld [vmem:[#allocation2 + $0x10] sm:$0xff] }
  0x3b   :  { %v187_v14 = vunpack.c.l.s8.bf16 %v147_v12  ;;  %1163 = vmatprep.subr.bf16.mxu1 %v195_v10  ;;  %v188_v18 = vunpack.c.h.s8.bf16 %v147_v12  ;;  %v85_v24 = vld [vmem:[%s1738_s0] sm:$0xff]  ;;  %v189_v26 = vunpack.c.l.s8.bf16 %v148_v22  ;;  %v182_v27 = vunpack.c.h.s8.bf16 %v144_v15  ;;  %v149_v34 = vld [vmem:[#allocation2 + $0x50] sm:$0xff]  ;;  %v146_v48 = vld [vmem:[#allocation2 + $0x38] sm:$0xff] }
  0x3c   :  { %1142 = vmatpush3.bf16.msra.mxu0 %v171_v13  ;;  %v1589_v23 = vsub.s32 %v92_v6, %v1586_v7  ;;  %v198_v28 = vunpack.c.h.s8.bf16 %v152_v16  ;;  %v89_v30 = vcombine.high %v85_v24, %v85_v24  ;;  %v174_v37 = vunpack.c.h.s8.bf16 %v140_v21  ;;  %v154_v49 = vld [vmem:[#allocation2 + $0x78] sm:$0xff]  ;;  %v86_v50 = vld [vmem:[%s1738_s0 + $0x8] sm:$0xff]  ;;  %v159_v62 = vld [vmem:[#allocation2 + $0xa0] sm:$0xff] }
  0x3d   :  { %1164 = vmatpush3.bf16.msra.mxu1 %v187_v14  ;;  %1143 = vmatprep.subr.bf16.mxu0 %v180_v9  ;;  %v190_v38 = vunpack.c.h.s8.bf16 %v148_v22  ;;  %v183_v39 = vunpack.c.l.s8.bf16 %v145_v31  ;;  %v199_v40 = vunpack.c.l.s8.bf16 %v153_v32  ;;  %v175_v44 = vunpack.c.l.s8.bf16 %v141_v33  ;;  %v142_v55 = vld [vmem:[#allocation2 + $0x18] sm:$0xff]  ;;  %v167_v63 = vld [vmem:[#allocation2 + $0xe0] sm:$0xff] }
  0x3e   :  { %1165 = vmatprep.subr.bf16.mxu1 %v196_v11  ;;  %v1595_v29 = vrot.slane %v85_v24, %v1589_v23  ;;  %v1600_v36 = vrot.slane %v89_v30, %v1589_v23  ;;  %v191_v45 = vunpack.c.l.s8.bf16 %v149_v34  ;;  %v184_v46 = vunpack.c.h.s8.bf16 %v145_v31  ;;  %v150_v56 = vld [vmem:[#allocation2 + $0x58] sm:$0xff]  ;;  %v155_v8 = vld [vmem:[#allocation2 + $0x80] sm:$0xff] }
  0x3f   :  { %v200_v47 = vunpack.c.h.s8.bf16 %v153_v32  ;;  %v176_v51 = vunpack.c.h.s8.bf16 %v141_v33  ;;  %v192_v52 = vunpack.c.h.s8.bf16 %v149_v34  ;;  %v185_v53 = vunpack.c.l.s8.bf16 %v146_v48  ;;  %v163_v9 = vld [vmem:[#allocation2 + $0xc0] sm:$0xff]  ;;  %v161_v32 = vld [vmem:[#allocation2 + $0xb0] sm:$0xff] }
  0x40   :  { %1144 = vmatpush3.bf16.msra.mxu0 %v172_v17  ;;  %v104_v35 = vcombine.high %v1595_v29, %v1595_v29  ;;  %v105_v42 = vcombine.high %v1600_v36, %v1600_v36  ;;  %v201_v54 = vunpack.c.l.s8.bf16 %v154_v49  ;;  %v106_v57 = vcombine.high %v86_v50, %v86_v50  ;;  %v169_v33 = vld [vmem:[#allocation2 + $0xf0] sm:$0xff] }
  0x41   :  { %1166 = vmatpush3.bf16.msra.mxu1 %v188_v18  ;;  %1145 = vmatprep.subr.bf16.mxu0 %v181_v19  ;;  %v177_v58 = vunpack.c.l.s8.bf16 %v142_v55  ;;  %v193_v59 = vunpack.c.l.s8.bf16 %v150_v56  ;;  %v186_v60 = vunpack.c.h.s8.bf16 %v146_v48  ;;  %v202_v61 = vunpack.c.h.s8.bf16 %v154_v49  ;;  %v160_v18 = vld [vmem:[#allocation2 + $0xa8] sm:$0xff] }
  0x42   :  { %1167 = vmatprep.subr.bf16.mxu1 %v197_v20  ;;  %v132_v41 = vpack.c.bf16 %v104_v35, %v104_v35  ;;  %v134_v43 = vpack.c.bf16 %v105_v42, %v105_v42  ;;  %v1608_v0 = vrot.slane %v86_v50, %v1589_v23  ;;  %v1611_v1 = vrot.slane %v106_v57, %v1589_v23  ;;  %v168_v19 = vld [vmem:[#allocation2 + $0xe8] sm:$0xff]  ;;  %v158_v50 = vld [vmem:[#allocation2 + $0x98] sm:$0xff] }
  0x43   :  { %v178_v3 = vunpack.c.h.s8.bf16 %v142_v55  ;;  %v194_v4 = vunpack.c.h.s8.bf16 %v150_v56  ;;  %v211_v5 = vunpack.c.l.s8.bf16 %v159_v62  ;;  %v227_v6 = vunpack.c.l.s8.bf16 %v167_v63 }
  0x44   :  { %1146 = vmatpush3.bf16.msra.mxu0 %v173_v25  ;;  %267 = vmatprep.mubr.bf16.mxu0 %v132_v41  ;;  %v121_v10 = vcombine.high %v1608_v0, %v1608_v0  ;;  %v122_v11 = vcombine.high %v1611_v1, %v1611_v1  ;;  %v131_v12 = vpack.c.bf16 %v1595_v29, %v1595_v29  ;;  %v203_v14 = vunpack.c.l.s8.bf16 %v155_v8 }
  0x45   :  { %1168 = vmatpush3.bf16.msra.mxu1 %v189_v26  ;;  %1147 = vmatprep.subr.bf16.mxu0 %v182_v27  ;;  %v133_v13 = vpack.c.bf16 %v1600_v36, %v1600_v36  ;;  %v219_v15 = vunpack.c.l.s8.bf16 %v163_v9  ;;  %v212_v16 = vunpack.c.h.s8.bf16 %v159_v62  ;;  %v228_v17 = vunpack.c.h.s8.bf16 %v167_v63  ;;  %v156_v26 = vld [vmem:[#allocation2 + $0x88] sm:$0xff]  ;;  %v414_v62 = vld [vmem:[%s1743_s5 + $0x10] sm:$0xff] }
  0x46   :  { %1169 = vmatprep.subr.bf16.mxu1 %v198_v28  ;;  %307 = vmatprep.mubr.bf16.mxu1 %v134_v43  ;;  %v136_v20 = vpack.c.bf16 %v121_v10, %v121_v10  ;;  %v138_v21 = vpack.c.bf16 %v122_v11, %v122_v11  ;;  %v204_v22 = vunpack.c.h.s8.bf16 %v155_v8  ;;  %v220_v23 = vunpack.c.h.s8.bf16 %v163_v9  ;;  %v164_v27 = vld [vmem:[#allocation2 + $0xc8] sm:$0xff]  ;;  %v418_v8 = vld [vmem:[%s1743_s5 + $0x30] sm:$0xff]  ;;  %v419_v9 = vld [vmem:[%s1743_s5 + $0x38] sm:$0xff] }
  0x47   :  { %v213_v24 = vunpack.c.l.s8.bf16 %v160_v18  ;;  %v229_v25 = vunpack.c.l.s8.bf16 %v168_v19  ;;  %v205_v28 = vunpack.c.l.s8.bf16 %v156_v26  ;;  %v221_v29 = vunpack.c.l.s8.bf16 %v164_v27  ;;  %v420_v11 = vld [vmem:[%s1743_s5 + $0x40] sm:$0xff] }
  0x48   :  { %1148 = vmatpush3.bf16.msra.mxu0 %v174_v37  ;;  %v214_v30 = vunpack.c.h.s8.bf16 %v160_v18  ;;  %v230_v31 = vunpack.c.h.s8.bf16 %v168_v19  ;;  %v206_v34 = vunpack.c.h.s8.bf16 %v156_v26  ;;  %v222_v35 = vunpack.c.h.s8.bf16 %v164_v27  ;;  %v425_v18 = vld [vmem:[%s1743_s5 + $0x68] sm:$0xff] }
  0x49   :  { %1170 = vmatpush3.bf16.msra.mxu1 %v190_v38  ;;  %1149 = vmatprep.subr.bf16.mxu0 %v183_v39  ;;  %v215_v36 = vunpack.c.l.s8.bf16 %v161_v32  ;;  %v231_v37 = vunpack.c.l.s8.bf16 %v169_v33  ;;  %v157_v38 = vld [vmem:[#allocation2 + $0x90] sm:$0xff]  ;;  %v216_v42 = vunpack.c.h.s8.bf16 %v161_v32  ;;  %v232_v43 = vunpack.c.h.s8.bf16 %v169_v33 }
  0x4a   :  { %1171 = vmatprep.subr.bf16.mxu1 %v199_v40  ;;  %v165_v39 = vld [vmem:[#allocation2 + $0xd0] sm:$0xff]  ;;  %v207_v40 = vunpack.c.l.s8.bf16 %v157_v38  ;;  %v210_v56 = vunpack.c.h.s8.bf16 %v158_v50  ;;  %v1471_v63 = vmov 0.0|0.0   ;;  %v1320_v10 = vpack.c.bf16 %v419_v9, %v418_v8  ;;  %v639_v8 = vld [vmem:[#allocation6 + $0x40] sm:$0xff] }
  0x4b   :  { %v223_v41 = vunpack.c.l.s8.bf16 %v165_v39  ;;  %vm1472_vm0 = vmmov 0   ;;  %v679_v9 = vunpack.c.l.s8.bf16 %v639_v8 }
  0x4c   :  { %1150 = vmatpush3.bf16.msra.mxu0 %v175_v44  ;;  %v162_v44 = vld [vmem:[#allocation2 + $0xb8] sm:$0xff] }
  0x4d   :  { %1172 = vmatpush3.bf16.msra.mxu1 %v191_v45  ;;  %1151 = vmatprep.subr.bf16.mxu0 %v184_v46  ;;  %v170_v45 = vld [vmem:[#allocation2 + $0xf8] sm:$0xff]  ;;  %v208_v46 = vunpack.c.h.s8.bf16 %v157_v38  ;;  %v217_v48 = vunpack.c.l.s8.bf16 %v162_v44 }
  0x4e   :  { %1173 = vmatprep.subr.bf16.mxu1 %v200_v47  ;;  %v224_v47 = vunpack.c.h.s8.bf16 %v165_v39  ;;  %v233_v49 = vunpack.c.l.s8.bf16 %v170_v45  ;;  %v234_v55 = vunpack.c.h.s8.bf16 %v170_v45 }
  0x50   :  { %1152 = vmatpush3.bf16.msra.mxu0 %v176_v51  ;;  %v166_v51 = vld [vmem:[#allocation2 + $0xd8] sm:$0xff] }
  0x51   :  { %1174 = vmatpush3.bf16.msra.mxu1 %v192_v52  ;;  %1153 = vmatprep.subr.bf16.mxu0 %v185_v53  ;;  %v209_v52 = vunpack.c.l.s8.bf16 %v158_v50  ;;  %v225_v53 = vunpack.c.l.s8.bf16 %v166_v51  ;;  %v226_v57 = vunpack.c.h.s8.bf16 %v166_v51  ;;  %v1118_v50 = vld [vmem:[%s1742_s4] ss:$0 sm:$0xff] }
  0x52   :  { %1175 = vmatprep.subr.bf16.mxu1 %v201_v54  ;;  %v218_v54 = vunpack.c.h.s8.bf16 %v162_v44 }
  0x54   :  { %1154 = vmatpush3.bf16.msra.mxu0 %v177_v58  ;;  %v135_v58 = vpack.c.bf16 %v1608_v0, %v1608_v0 }
  0x55   :  { %1176 = vmatpush3.bf16.msra.mxu1 %v193_v59  ;;  %1155 = vmatprep.subr.bf16.mxu0 %v186_v60  ;;  %v137_v59 = vpack.c.bf16 %v1611_v1, %v1611_v1  ;;  %v412_v60 = vld [vmem:[%s1743_s5] sm:$0xff]  ;;  %v415_v1 = vld [vmem:[%s1743_s5 + $0x18] sm:$0xff] }
  0x56   :  { %1177 = vmatprep.subr.bf16.mxu1 %v202_v61  ;;  %v413_v61 = vld [vmem:[%s1743_s5 + $0x8] sm:$0xff] }
  0x57   :  { %v1311_v0 = vpack.c.bf16 %v413_v61, %v412_v60  ;;  %v632_v60 = vld [vmem:[#allocation6 + $0x8] sm:$0xff]  ;;  %v1679_v61 = vld [vmem:[#allocation6 + $0x18] sm:$0xff] }
  0x58   :  { %1156 = vmatpush3.bf16.msra.mxu0 %v178_v3  ;;  %v1314_v3 = vpack.c.bf16 %v415_v1, %v414_v62  ;;  %v631_v62 = vld [vmem:[#allocation6] sm:$0xff] }
  0x59   :  { %1178 = vmatpush3.bf16.msra.mxu1 %v194_v4  ;;  %1185 = vmatprep.subr.bf16.mxu0 %v211_v5  ;;  %v416_v4 = vld [vmem:[%s1743_s5 + $0x20] sm:$0xff]  ;;  %v417_v5 = vld [vmem:[%s1743_s5 + $0x28] sm:$0xff]  ;;  %v663_v1 = vunpack.c.l.s8.bf16 %v631_v62 }
  0x5a   :  { %1207 = vmatprep.subr.bf16.mxu1 %v227_v6  ;;  %v1317_v6 = vpack.c.bf16 %v417_v5, %v416_v4  ;;  %v671_v4 = vunpack.c.h.s8.bf16 %v631_v62  ;;  %v640_v5 = vld [vmem:[#allocation6 + $0x48] sm:$0xff] }
  0x5b   :  { %268 = vmatmul.mubr.bf16.vlgmr.msra.gmra.mrb[0].mxu0 %v131_v12  ;;  %v421_v12 = vld [vmem:[%s1743_s5 + $0x48] sm:$0xff] }
  0x5c   :  { %308 = vmatmul.mubr.bf16.vlgmr.msra.gmra.mrb[0].mxu1 %v133_v13  ;;  %1186 = vmatpush3.bf16.msra.mxu0 %v203_v14  ;;  %v1323_v13 = vpack.c.bf16 %v421_v12, %v420_v11  ;;  %v422_v14 = vld [vmem:[%s1743_s5 + $0x50] sm:$0xff]  ;;  %v687_v11 = vunpack.c.h.s8.bf16 %v639_v8  ;;  %v648_v12 = vld [vmem:[#allocation6 + $0x88] sm:$0xff] }
  0x5d   :  { %1208 = vmatpush3.bf16.msra.mxu1 %v219_v15  ;;  %1187 = vmatprep.subr.bf16.mxu0 %v212_v16  ;;  %v423_v15 = vld [vmem:[%s1743_s5 + $0x58] sm:$0xff] }
  0x5e   :  { %1209 = vmatprep.subr.bf16.mxu1 %v228_v17  ;;  %347 = vmatprep.mubr.bf16.mxu0 %v136_v20  ;;  %v1326_v16 = vpack.c.bf16 %v423_v15, %v422_v14  ;;  %v424_v17 = vld [vmem:[%s1743_s5 + $0x60] sm:$0xff]  ;;  %v426_v20 = vld [vmem:[%s1743_s5 + $0x70] sm:$0xff] }
  0x5f   :  { %387 = vmatprep.mubr.bf16.mxu1 %v138_v21  ;;  %v1329_v19 = vpack.c.bf16 %v425_v18, %v424_v17  ;;  %v427_v21 = vld [vmem:[%s1743_s5 + $0x78] sm:$0xff]  ;;  %v647_v14 = vld [vmem:[#allocation6 + $0x80] sm:$0xff]  ;;  %v1682_v18 = vld [vmem:[#allocation6 + $0xc8] sm:$0xff] }
  0x60   :  { %1188 = vmatpush3.bf16.msra.mxu0 %v204_v22  ;;  %v1332_v22 = vpack.c.bf16 %v427_v21, %v426_v20  ;;  %v695_v15 = vunpack.c.l.s8.bf16 %v647_v14  ;;  %v703_v17 = vunpack.c.h.s8.bf16 %v647_v14  ;;  %v1685_v20 = vld [vmem:[#allocation6 + $0xc0] sm:$0xff] }
  0x61   :  { %1210 = vmatpush3.bf16.msra.mxu1 %v220_v23  ;;  %1189 = vmatprep.subr.bf16.mxu0 %v213_v24  ;;  %v1473_v23 = vmov 0.0   ;;  %v1350_v24 = vld [vmem:[#allocation4] sm:$0xff]   ;;  %v711_v21 = vunpack.c.l.s8.bf16 %v1685_v20 }
  0x62   :  { %1211 = vmatprep.subr.bf16.mxu1 %v229_v25  ;;  %v1351_v25 = vld [vmem:[#allocation4 + $0x8] sm:$0xff]  }
  0x64   :  { %1190 = vmatpush3.bf16.msra.mxu0 %v205_v28 }
  0x65   :  { %1212 = vmatpush3.bf16.msra.mxu1 %v221_v29  ;;  %1191 = vmatprep.subr.bf16.mxu0 %v214_v30 }
  0x66   :  { %1213 = vmatprep.subr.bf16.mxu1 %v230_v31 }
  0x68   :  { %1192 = vmatpush3.bf16.msra.mxu0 %v206_v34 }
  0x69   :  { %1214 = vmatpush3.bf16.msra.mxu1 %v222_v35  ;;  %1193 = vmatprep.subr.bf16.mxu0 %v215_v36 }
  0x6a   :  { %1215 = vmatprep.subr.bf16.mxu1 %v231_v37 }
  0x6c   :  { %1194 = vmatpush3.bf16.msra.mxu0 %v207_v40 }
  0x6d   :  { %1216 = vmatpush3.bf16.msra.mxu1 %v223_v41  ;;  %1195 = vmatprep.subr.bf16.mxu0 %v216_v42 }
  0x6e   :  { %1217 = vmatprep.subr.bf16.mxu1 %v232_v43 }
  0x70   :  { %1196 = vmatpush3.bf16.msra.mxu0 %v208_v46 }
  0x71   :  { %1218 = vmatpush3.bf16.msra.mxu1 %v224_v47  ;;  %1197 = vmatprep.subr.bf16.mxu0 %v217_v48  ;;  %v1117_v48 = vld [vmem:[%s1741_s3] ss:$0 sm:$0xff] }
  0x72   :  { %1219 = vmatprep.subr.bf16.mxu1 %v233_v49 }
  0x74   :  { %1198 = vmatpush3.bf16.msra.mxu0 %v209_v52 }
  0x75   :  { %1220 = vmatpush3.bf16.msra.mxu1 %v225_v53  ;;  %1199 = vmatprep.subr.bf16.mxu0 %v218_v54  ;;  %v1352_v54 = vld [vmem:[#allocation4 + $0x10] sm:$0xff]  }
  0x76   :  { %1221 = vmatprep.subr.bf16.mxu1 %v234_v55  ;;  %v1353_v55 = vld [vmem:[#allocation4 + $0x18] sm:$0xff]  }
  0x78   :  { %1200 = vmatpush3.bf16.msra.mxu0 %v210_v56  ;;  %v1354_v56 = vld [vmem:[#allocation4 + $0x20] sm:$0xff]  }
  0x79   :  { %1222 = vmatpush3.bf16.msra.mxu1 %v226_v57  ;;  %1310 = vmatprep.subr.bf16.mxu0 %v1471_v63  ;;  %v1355_v57 = vld [vmem:[#allocation4 + $0x28] sm:$0xff]  }
  0x7a   :  { %1290 = vmatprep.subr.bf16.mxu1 %v1473_v23 }
  0x7b   :  { %348 = vmatmul.mubr.bf16.vlgmr.msra.gmra.mrb[4].mxu0 %v135_v58  ;;  %v1356_v58 = vld [vmem:[#allocation4 + $0x30] sm:$0xff]  }
  0x7c   :  { %388 = vmatmul.mubr.bf16.vlgmr.msra.gmra.mrb[4].mxu1 %v137_v59  ;;  %1312 = vmatpush3.bf16.msra.mxu0 %v1311_v0  ;;  %v1357_v59 = vld [vmem:[#allocation4 + $0x38] sm:$0xff]   ;;  %v666_v0 = vunpack.c.l.s8.bf16 %v1679_v61 }
  0x7d   :  { %1313 = vmatprep.subr.bf16.mxu0 %v1471_v63  ;;  %1287 = vmatprep.mubr.msk.f32.mxu0 %vm1472_vm0, %v1473_v23 }
  0x7e   :  { %1306 = vmatprep.mubr.msk.bf16.mxu1 %vm1472_vm0, %v1473_v23  ;;  %1291 = vmatpush3.bf16.msra.mxu1 %v1350_v24 }
  0x7f   :  { %1292 = vmatprep.subr.bf16.mxu1 %v1473_v23 }
  0x80   :  { %1315 = vmatpush3.bf16.msra.mxu0 %v1314_v3  ;;  %v672_v3 = vunpack.c.h.s8.bf16 %v632_v60 }
  0x81   :  { %1316 = vmatprep.subr.bf16.mxu0 %v1471_v63 }
  0x82   :  { %1293 = vmatpush3.bf16.msra.mxu1 %v1351_v25 }
  0x83   :  { %1294 = vmatprep.subr.bf16.mxu1 %v1473_v23 }
  0x84   :  { %1318 = vmatpush3.bf16.msra.mxu0 %v1317_v6  ;;  %v680_v6 = vunpack.c.l.s8.bf16 %v640_v5 }
  0x85   :  { %1319 = vmatprep.subr.bf16.mxu0 %v1471_v63 }
  0x86   :  { %1295 = vmatpush3.bf16.msra.mxu1 %v1352_v54 }
  0x87   :  { %1296 = vmatprep.subr.bf16.mxu1 %v1473_v23 }
  0x88   :  { %1321 = vmatpush3.bf16.msra.mxu0 %v1320_v10  ;;  %v688_v10 = vunpack.c.h.s8.bf16 %v640_v5  ;;  %v635_v5 = vld [vmem:[#allocation6 + $0x20] sm:$0xff] }
  0x89   :  { %1322 = vmatprep.subr.bf16.mxu0 %v1471_v63 }
  0x8a   :  { %1297 = vmatpush3.bf16.msra.mxu1 %v1353_v55  ;;  %v720_v55 = vunpack.c.h.s8.bf16 %v1682_v18 }
  0x8b   :  { %1298 = vmatprep.subr.bf16.mxu1 %v1473_v23 }
  0x8c   :  { %1324 = vmatpush3.bf16.msra.mxu0 %v1323_v13  ;;  %v696_v13 = vunpack.c.l.s8.bf16 %v648_v12 }
  0x8d   :  { %1325 = vmatprep.subr.bf16.mxu0 %v1471_v63 }
  0x8e   :  { %1299 = vmatpush3.bf16.msra.mxu1 %v1354_v56 }
  0x8f   :  { %1300 = vmatprep.subr.bf16.mxu1 %v1473_v23 }
  0x90   :  { %1327 = vmatpush3.bf16.msra.mxu0 %v1326_v16  ;;  %v704_v16 = vunpack.c.h.s8.bf16 %v648_v12 }
  0x91   :  { %1328 = vmatprep.subr.bf16.mxu0 %v1471_v63 }
  0x92   :  { %1301 = vmatpush3.bf16.msra.mxu1 %v1355_v57  ;;  %v719_v57 = vunpack.c.h.s8.bf16 %v1685_v20 }
  0x93   :  { %1302 = vmatprep.subr.bf16.mxu1 %v1473_v23 }
  0x94   :  { %1330 = vmatpush3.bf16.msra.mxu0 %v1329_v19  ;;  %v712_v19 = vunpack.c.l.s8.bf16 %v1682_v18  ;;  %v675_v18 = vunpack.c.h.s8.bf16 %v635_v5 }
  0x95   :  { %1331 = vmatprep.subr.bf16.mxu0 %v1471_v63  ;;  %v664_v63 = vunpack.c.l.s8.bf16 %v632_v60  ;;  %v638_v60 = vld [vmem:[#allocation6 + $0x38] sm:$0xff] }
  0x96   :  { %1303 = vmatpush3.bf16.msra.mxu1 %v1356_v58  ;;  %v670_v62 = vunpack.c.l.s8.bf16 %v638_v60 }
  0x97   :  { %1304 = vmatprep.subr.bf16.mxu1 %v1473_v23 }
  0x98   :  { %1333 = vmatpush3.bf16.msra.mxu0 %v1332_v22  ;;  %v1119_v22 = vld [vmem:[%s1744_s6] ss:$0 sm:$0xff] }
  0x99   :  { %728 = vmatprep.subr.bf16.mxu0 %v664_v63  ;;  %v1474_v63 = vmov 0  }
  0x9a   :  { %1305 = vmatpush3.bf16.msra.mxu1 %v1357_v59  ;;  %v636_v59 = vld [vmem:[#allocation6 + $0x28] sm:$0xff] }
  0x9b   :  { %769 = vmatprep.subr.bf16.mxu1 %v666_v0  ;;  %v1120_v0 = vld [vmem:[%s1746_s8] ss:$0 sm:$0xff]  ;;  %v676_v14 = vunpack.c.h.s8.bf16 %v636_v59 }
 0x12e   :  { %v1157_v26 = vpop.f32.mrb[0].mxu0 }
 0x12f   :  { %v1179_v27 = vpop.f32.mrb[0].mxu1  ;;  %v1158_v28 = vpop.f32.mrb[1].mxu0 }
 0x130   :  { %v1180_v29 = vpop.f32.mrb[1].mxu1  ;;  %v1159_v30 = vadd.f32 %v1158_v28, %v1157_v26  ;;  %v1160_v32 = vpop.f32.mrb[2].mxu0  ;;  %v506_v28 = vand.u32 127, %v93_v2  ;;  %v674_v2 = vunpack.c.h.s8.bf16 %v1679_v61  ;;  %v668_v61 = vunpack.c.l.s8.bf16 %v636_v59 }
 0x131   :  { %v1181_v31 = vadd.f32 %v1180_v29, %v1179_v27  ;;  %v1182_v33 = vpop.f32.mrb[2].mxu1  ;;  %v1161_v34 = vpop.f32.mrb[3].mxu0  ;;  %v515_v29 = vld [vmem:[%s1739_s1] sm:$0x3] }
 0x132   :  { %v1183_v35 = vpop.f32.mrb[3].mxu1  ;;  %vm511_vm1 = vcmp.lt.s32.totalorder %v506_v28, 64  ;;  %vm510_vm2 = vcmp.lt.s32.totalorder %v506_v28, 32  ;;  %v652_v28 = vld [vmem:[#allocation6 + $0xa8] sm:$0xff] }
 0x133   :  { %v310_v36 = vadd.f32 %v1181_v31, %v1159_v30  ;;  %v633_v31 = vld [vmem:[#allocation6 + $0x10] sm:$0xff] }
 0x14e   :  { %v1201_v37 = vpop.f32.mrb[4].mxu0 }
 0x14f   :  { %v1223_v38 = vpop.f32.mrb[4].mxu1  ;;  %v1202_v39 = vpop.f32.mrb[5].mxu0 }
 0x150   :  { %v1224_v40 = vpop.f32.mrb[5].mxu1  ;;  %v1203_v41 = vadd.f32 %v1202_v39, %v1201_v37  ;;  %v1204_v43 = vpop.f32.mrb[6].mxu0  ;;  %v673_v39 = vunpack.c.h.s8.bf16 %v633_v31 }
 0x151   :  { %v1225_v42 = vadd.f32 %v1224_v40, %v1223_v38  ;;  %v1226_v44 = vpop.f32.mrb[6].mxu1  ;;  %v1205_v45 = vpop.f32.mrb[7].mxu0  ;;  %v642_v38 = vld [vmem:[#allocation6 + $0x58] sm:$0xff] }
 0x152   :  { %v1227_v46 = vpop.f32.mrb[7].mxu1  ;;  %v350_v47 = vadd.f32 %v1203_v41, %v310_v36  ;;  %v665_v36 = vunpack.c.l.s8.bf16 %v633_v31  ;;  %v682_v40 = vunpack.c.l.s8.bf16 %v642_v38  ;;  %v641_v41 = vld [vmem:[#allocation6 + $0x50] sm:$0xff]  ;;  %v690_v43 = vunpack.c.h.s8.bf16 %v642_v38  ;;  %v650_v44 = vld [vmem:[#allocation6 + $0x98] sm:$0xff] }
 0x153   :  { %v689_v45 = vunpack.c.h.s8.bf16 %v641_v41  ;;  %v698_v46 = vunpack.c.l.s8.bf16 %v650_v44 }
 0x154   :  { %v390_v49 = vadd.f32 %v1225_v42, %v350_v47  ;;  %v681_v42 = vunpack.c.l.s8.bf16 %v641_v41  ;;  %v649_v47 = vld [vmem:[#allocation6 + $0x90] sm:$0xff] }
 0x156   :  { %v402_v51 = vmul.f32 %v1117_v48, %v390_v49  ;;  %v697_v48 = vunpack.c.l.s8.bf16 %v649_v47  ;;  %v706_v49 = vunpack.c.h.s8.bf16 %v650_v44 }
 0x158   :  { %v410_v52 = vadd.f32 %v1118_v50, %v402_v51  ;;  %v658_v50 = vld [vmem:[#allocation6 + $0xd8] sm:$0xff]  ;;  %v705_v51 = vunpack.c.h.s8.bf16 %v649_v47 }
 0x159   :  { %v722_v56 = vunpack.c.h.s8.bf16 %v658_v50 }
 0x15a   :  { %v411_v53 = vmax.f32 %v410_v52, 0.0  ;;  %v714_v52 = vunpack.c.l.s8.bf16 %v658_v50 }
 0x15c   :  { %1288 = vmatmul.mubr.f32.vlgmr.msra.gmra.mrb[8].mxu0 %v411_v53  ;;  %v657_v53 = vld [vmem:[#allocation6 + $0xd0] sm:$0xff] }
 0x15d   :  { %729 = vmatpush1.bf16.msra.mxu0 %v663_v1  ;;  %v713_v54 = vunpack.c.l.s8.bf16 %v657_v53  ;;  %v721_v58 = vunpack.c.h.s8.bf16 %v657_v53  ;;  %760 = vmatprep.mubr.bf16.mxu0 %v1474_v63  ;;  %v896_v53 = vsub.s32 0, %v1586_v7 }
 0x15e   :  { %730 = vmatprep.subr.bf16.mxu0 %v672_v3 }
 0x161   :  { %731 = vmatpush1.bf16.msra.mxu0 %v671_v4 }
 0x162   :  { %732 = vmatprep.subr.bf16.mxu0 %v680_v6  ;;  %v637_v6 = vld [vmem:[#allocation6 + $0x30] sm:$0xff] }
 0x163   :  { %v669_v12 = vunpack.c.l.s8.bf16 %v637_v6 }
 0x165   :  { %733 = vmatpush1.bf16.msra.mxu0 %v679_v9 }
 0x166   :  { %734 = vmatprep.subr.bf16.mxu0 %v688_v10 }
 0x169   :  { %735 = vmatpush1.bf16.msra.mxu0 %v687_v11  ;;  %v667_v11 = vunpack.c.l.s8.bf16 %v635_v5 }
 0x16a   :  { %736 = vmatprep.subr.bf16.mxu0 %v696_v13 }
 0x16d   :  { %737 = vmatpush1.bf16.msra.mxu0 %v695_v15  ;;  %v678_v15 = vunpack.c.h.s8.bf16 %v638_v60 }
 0x16e   :  { %738 = vmatprep.subr.bf16.mxu0 %v704_v16  ;;  %v644_v16 = vld [vmem:[#allocation6 + $0x68] sm:$0xff] }
 0x16f   :  { %v684_v20 = vunpack.c.l.s8.bf16 %v644_v16 }
 0x171   :  { %739 = vmatpush1.bf16.msra.mxu0 %v703_v17  ;;  %v646_v17 = vld [vmem:[#allocation6 + $0x78] sm:$0xff] }
 0x172   :  { %740 = vmatprep.subr.bf16.mxu0 %v712_v19  ;;  %v677_v19 = vunpack.c.h.s8.bf16 %v637_v6 }
 0x175   :  { %741 = vmatpush1.bf16.msra.mxu0 %v711_v21  ;;  %v686_v21 = vunpack.c.l.s8.bf16 %v646_v17 }
 0x176   :  { %742 = vmatprep.subr.bf16.mxu0 %v720_v55  ;;  %v892_v55 = vld [vmem:[%s1748_s10] sm:$0xff] }
 0x177   :  { %v897_v59 = vrot.slane %v892_v55, %v896_v53 }
 0x179   :  { %743 = vmatpush1.bf16.msra.mxu0 %v719_v57  ;;  %v908_v57 = vsub.s32 3, %v1586_v7 }
 0x17a   :  { %810 = vmatprep.subr.bf16.mxu0 %v668_v61 }
 0x22f   :  { %v501_v23 = vpop.f32.mrb[8].mxu0 }
 0x230   :  { %v502_v24 = vadd.f32 %v1119_v22, %v501_v23  ;;  %v1289_v25 = vpop.f32.mrb[9].mxu0  ;;  %v643_v22 = vld [vmem:[#allocation6 + $0x60] sm:$0xff]  ;;  %v645_v23 = vld [vmem:[#allocation6 + $0x70] sm:$0xff] }
 0x231   :  { %v685_v25 = vunpack.c.l.s8.bf16 %v645_v23  ;;  %v693_v31 = vunpack.c.h.s8.bf16 %v645_v23 }
 0x232   :  { %v507_v26 = vmul.f32 0.5, %v502_v24 }
 0x234   :  { %v508_v27 = vmul.f32 1.442695, %v507_v26  ;;  %v692_v26 = vunpack.c.h.s8.bf16 %v644_v16 }
 0x236   :  { %1358 = vpow2.f32 %v508_v27  ;;  %v694_v27 = vunpack.c.h.s8.bf16 %v646_v17 }
 0x240   :  { %v1359_v30 = vpop.eup %1358 }
 0x241   :  { %v512_v32 = vsel %vm511_vm1, %v1359_v30, 0.0  ;;  %v516_v33 = vmul.f32 %v1359_v30, %v515_v29  ;;  %v654_v29 = vld [vmem:[#allocation6 + $0xb8] sm:$0xff]  ;;  %v691_v30 = vunpack.c.h.s8.bf16 %v643_v22 }
 0x242   :  { %v513_v34 = vsel %vm510_vm2, %v502_v24, %v512_v32  ;;  %v700_v32 = vunpack.c.l.s8.bf16 %v652_v28  ;;  %v710_v38 = vunpack.c.h.s8.bf16 %v654_v29 }
 0x243   :  { %514 = vst [vmem:[%s1751_s13] sm:$0x3] %v513_v34  ;;  %v517_v35 = vsel %vm510_vm2, %v502_v24, %v516_v33  ;;  %v683_v24 = vunpack.c.l.s8.bf16 %v643_v22  ;;  %v702_v33 = vunpack.c.l.s8.bf16 %v654_v29  ;;  %v651_v34 = vld [vmem:[#allocation6 + $0xa0] sm:$0xff] }
 0x244   :  { %v518_v37 = vpack.c.bf16 %v517_v35, %v517_v35  ;;  %v653_v35 = vld [vmem:[#allocation6 + $0xb0] sm:$0xff]  ;;  %v707_v41 = vunpack.c.h.s8.bf16 %v651_v34 }
 0x246   :  { %1307 = vmatmul.mubr.bf16.vlgmr.msra.gmra.mrb[8].mxu1 %v518_v37  ;;  %v701_v37 = vunpack.c.l.s8.bf16 %v653_v35 }
 0x247   :  { %770 = vmatpush1.bf16.msra.mxu1 %v665_v36  ;;  %801 = vmatprep.mubr.bf16.mxu1 %v1474_v63  ;;  %v699_v36 = vunpack.c.l.s8.bf16 %v651_v34 }
 0x248   :  { %771 = vmatprep.subr.bf16.mxu1 %v674_v2  ;;  %v708_v2 = vunpack.c.h.s8.bf16 %v652_v28 }
 0x24b   :  { %772 = vmatpush1.bf16.msra.mxu1 %v673_v39  ;;  %v660_v39 = vld [vmem:[#allocation6 + $0xe8] sm:$0xff] }
 0x24c   :  { %773 = vmatprep.subr.bf16.mxu1 %v682_v40  ;;  %v662_v40 = vld [vmem:[#allocation6 + $0xf8] sm:$0xff] }
 0x24d   :  { %v718_v44 = vunpack.c.l.s8.bf16 %v662_v40  ;;  %v726_v50 = vunpack.c.h.s8.bf16 %v662_v40 }
 0x24f   :  { %774 = vmatpush1.bf16.msra.mxu1 %v681_v42  ;;  %v709_v42 = vunpack.c.h.s8.bf16 %v653_v35  ;;  %v912_v35 = vsub.s32 4, %v1586_v7 }
 0x250   :  { %775 = vmatprep.subr.bf16.mxu1 %v690_v43  ;;  %v716_v43 = vunpack.c.l.s8.bf16 %v660_v39 }
 0x253   :  { %776 = vmatpush1.bf16.msra.mxu1 %v689_v45  ;;  %v659_v45 = vld [vmem:[#allocation6 + $0xe0] sm:$0xff] }
 0x254   :  { %777 = vmatprep.subr.bf16.mxu1 %v698_v46  ;;  %v661_v46 = vld [vmem:[#allocation6 + $0xf0] sm:$0xff]  ;;  %v715_v47 = vunpack.c.l.s8.bf16 %v659_v45 }
 0x257   :  { %778 = vmatpush1.bf16.msra.mxu1 %v697_v48  ;;  %v717_v48 = vunpack.c.l.s8.bf16 %v661_v46 }
 0x258   :  { %779 = vmatprep.subr.bf16.mxu1 %v706_v49  ;;  %v724_v49 = vunpack.c.h.s8.bf16 %v660_v39  ;;  %v913_v39 = vrot.slane %v892_v55, %v912_v35 }
 0x25b   :  { %780 = vmatpush1.bf16.msra.mxu1 %v705_v51  ;;  %v723_v51 = vunpack.c.h.s8.bf16 %v659_v45 }
 0x25c   :  { %781 = vmatprep.subr.bf16.mxu1 %v714_v52  ;;  %v725_v52 = vunpack.c.h.s8.bf16 %v661_v46 }
 0x25f   :  { %782 = vmatpush1.bf16.msra.mxu1 %v713_v54  ;;  %v904_v54 = vsub.s32 2, %v1586_v7 }
 0x260   :  { %783 = vmatprep.subr.bf16.mxu1 %v722_v56  ;;  %v900_v56 = vsub.s32 1, %v1586_v7 }
 0x261   :  { %v905_v60 = vrot.slane %v892_v55, %v904_v54 }
 0x262   :  { %v901_v61 = vrot.slane %v892_v55, %v900_v56 }
 0x263   :  { %784 = vmatpush1.bf16.msra.mxu1 %v721_v58  ;;  %v1720_v58 = vld [vmem:[%s1749_s11] sm:$0xff] }
 0x264   :  { %851 = vmatprep.subr.bf16.mxu1 %v670_v62  ;;  %v909_v62 = vrot.slane %v892_v55, %v908_v57  ;;  %v959_v5 = vrot.slane %v1720_v58, %v908_v57  ;;  %v963_v46 = vrot.slane %v1720_v58, %v912_v35 }
 0x319   :  { %v624_v1 = vpop.f32.mrb[8].mxu1 }
 0x31a   :  { %v625_v3 = vadd.f32 %v1120_v0, %v624_v1  ;;  %v1308_v4 = vpop.f32.mrb[9].mxu1  ;;  %v955_v0 = vrot.slane %v1720_v58, %v904_v54 }
 0x31b   :  { %v627_v8 = vpop.f32.mrb[10].mxu1  ;;  %v951_v4 = vrot.slane %v1720_v58, %v900_v56 }
 0x31c   :  { %v630_v9 = vmax.f32 %v625_v3, 0.0  ;;  %v1309_v10 = vpop.f32.mrb[11].mxu1 }
 0x31e   :  { %v1704_v13 = vpack.c.bf16 %v630_v9, %v630_v9 }
 0x320   :  { %761 = vmatmul.mubr.bf16.vlgmr.msra.gmra.mrb[12].mxu0 %v1704_v13  ;;  %802 = vmatmul.mubr.bf16.vlgmr.msra.gmra.mrb[12].mxu1 %v1704_v13 }
 0x321   :  { %811 = vmatpush1.bf16.msra.mxu0 %v667_v11  ;;  %852 = vmatpush1.bf16.msra.mxu1 %v669_v12 }
 0x322   :  { %812 = vmatprep.subr.bf16.mxu0 %v676_v14  ;;  %853 = vmatprep.subr.bf16.mxu1 %v678_v15 }
 0x323   :  { %842 = vmatprep.mubr.bf16.mxu0 %v1474_v63  ;;  %883 = vmatprep.mubr.bf16.mxu1 %v1474_v63  ;;  %v947_v63 = vrot.slane %v1720_v58, %v896_v53 }
 0x325   :  { %813 = vmatpush1.bf16.msra.mxu0 %v675_v18  ;;  %854 = vmatpush1.bf16.msra.mxu1 %v677_v19 }
 0x326   :  { %814 = vmatprep.subr.bf16.mxu0 %v684_v20  ;;  %855 = vmatprep.subr.bf16.mxu1 %v686_v21 }
 0x329   :  { %815 = vmatpush1.bf16.msra.mxu0 %v683_v24  ;;  %856 = vmatpush1.bf16.msra.mxu1 %v685_v25 }
 0x32a   :  { %816 = vmatprep.subr.bf16.mxu0 %v692_v26  ;;  %857 = vmatprep.subr.bf16.mxu1 %v694_v27 }
 0x32d   :  { %817 = vmatpush1.bf16.msra.mxu0 %v691_v30  ;;  %858 = vmatpush1.bf16.msra.mxu1 %v693_v31 }
 0x32e   :  { %818 = vmatprep.subr.bf16.mxu0 %v700_v32  ;;  %859 = vmatprep.subr.bf16.mxu1 %v702_v33  ;;  %v1475_v33 = vmov 1966171168  }
 0x32f   :  { %v1061_v34 = vunpack.c.l.s4 %v1475_v33 }
 0x331   :  { %819 = vmatpush1.bf16.msra.mxu0 %v699_v36  ;;  %860 = vmatpush1.bf16.msra.mxu1 %v701_v37  ;;  %v920_v36 = vsub.s32 6, %v1586_v7  ;;  %v916_v37 = vsub.s32 5, %v1586_v7 }
 0x332   :  { %820 = vmatprep.subr.bf16.mxu0 %v708_v2  ;;  %861 = vmatprep.subr.bf16.mxu1 %v710_v38  ;;  %v924_v2 = vsub.s32 7, %v1586_v7  ;;  %v1062_v38 = vunpack.c.0.s8 %v1061_v34 }
 0x333   :  { %v921_v40 = vrot.slane %v892_v55, %v920_v36 }
 0x334   :  { %v1065_v45 = vsub.s32 %v1062_v38, %v1586_v7 }
 0x335   :  { %821 = vmatpush1.bf16.msra.mxu0 %v707_v41  ;;  %862 = vmatpush1.bf16.msra.mxu1 %v709_v42  ;;  %v917_v42 = vrot.slane %v892_v55, %v916_v37 }
 0x336   :  { %822 = vmatprep.subr.bf16.mxu0 %v716_v43  ;;  %863 = vmatprep.subr.bf16.mxu1 %v718_v44  ;;  %v925_v43 = vrot.slane %v892_v55, %v924_v2 }
 0x339   :  { %823 = vmatpush1.bf16.msra.mxu0 %v715_v47  ;;  %864 = vmatpush1.bf16.msra.mxu1 %v717_v48  ;;  %v971_v47 = vrot.slane %v1720_v58, %v920_v36 }
 0x33a   :  { %824 = vmatprep.subr.bf16.mxu0 %v724_v49  ;;  %865 = vmatprep.subr.bf16.mxu1 %v726_v50 }
 0x33d   :  { %825 = vmatpush1.bf16.msra.mxu0 %v723_v51  ;;  %866 = vmatpush1.bf16.msra.mxu1 %v725_v52  ;;  %v967_v51 = vrot.slane %v1720_v58, %v916_v37  ;;  %v975_v52 = vrot.slane %v1720_v58, %v924_v2 }
 0x340   :  { %843 = vmatmul.mubr.bf16.vlgmr.msra.gmra.mrb[16].mxu0 %v1704_v13  ;;  %884 = vmatmul.mubr.bf16.vlgmr.msra.gmra.mrb[16].mxu1 %v1704_v13 }
 0x3f3   :  { %v762_v1 = vpop.f32.mrb[12].mxu0  ;;  %v803_v3 = vpop.f32.mrb[12].mxu1 }
 0x3f4   :  { %v934_v6 = vmul.f32 %v897_v59, %v762_v1  ;;  %v936_v8 = vmul.f32 %v905_v60, %v803_v3  ;;  %v764_v9 = vpop.f32.mrb[13].mxu0  ;;  %v805_v10 = vpop.f32.mrb[13].mxu1 }
 0x3f5   :  { %v935_v11 = vmul.f32 %v901_v61, %v764_v9  ;;  %v937_v12 = vmul.f32 %v909_v62, %v805_v10  ;;  %v766_v13 = vpop.f32.mrb[14].mxu0  ;;  %v807_v14 = vpop.f32.mrb[14].mxu1 }
 0x3f6   :  { %v984_v15 = vadd.f32 %v947_v63, %v934_v6  ;;  %v986_v16 = vadd.f32 %v955_v0, %v936_v8  ;;  %v767_v17 = vpop.f32.mrb[15].mxu0  ;;  %v808_v18 = vpop.f32.mrb[15].mxu1 }
 0x3f7   :  { %v985_v19 = vadd.f32 %v951_v4, %v935_v11  ;;  %v987_v20 = vadd.f32 %v959_v5, %v937_v12 }
 0x3f8   :  { %v1129_v21 = vmul.f32 -1.442695, %v984_v15  ;;  %v1131_v22 = vmul.f32 -1.442695, %v986_v16 }
 0x3f9   :  { %v1130_v23 = vmul.f32 -1.442695, %v985_v19  ;;  %v1132_v24 = vmul.f32 -1.442695, %v987_v20 }
 0x3fa   :  { %1360 = vpow2.f32 %v1129_v21 }
 0x3fb   :  { %1362 = vpow2.f32 %v1131_v22 }
 0x3fc   :  { %1364 = vpow2.f32 %v1130_v23 }
 0x3fd   :  { %1366 = vpow2.f32 %v1132_v24 }
 0x404   :  { %v1361_v25 = vpop.eup %1360 }
 0x405   :  { %v1363_v26 = vpop.eup %1362  ;;  %v1016_v27 = vadd.f32 1.0, %v1361_v25 }
 0x406   :  { %v1365_v28 = vpop.eup %1364  ;;  %v1018_v29 = vadd.f32 1.0, %v1363_v26 }
 0x407   :  { %v1367_v30 = vpop.eup %1366  ;;  %1368 = vrcp.f32 %v1016_v27  ;;  %v1017_v31 = vadd.f32 1.0, %v1365_v28 }
 0x408   :  { %1370 = vrcp.f32 %v1018_v29  ;;  %v1019_v32 = vadd.f32 1.0, %v1367_v30 }
 0x409   :  { %1372 = vrcp.f32 %v1017_v31 }
 0x40a   :  { %1374 = vrcp.f32 %v1019_v32 }
 0x411   :  { %v1369_v41 = vpop.eup %1368 }
 0x412   :  { %v1371_v44 = vpop.eup %1370 }
 0x413   :  { %v1373_v48 = vpop.eup %1372  ;;  %v844_v49 = vpop.f32.mrb[16].mxu0 }
 0x414   :  { %v885_v50 = vpop.f32.mrb[16].mxu1  ;;  %v1375_v53 = vpop.eup %1374  ;;  %v1137_v54 = vpack.c.bf16 %v1373_v48, %v1369_v41  ;;  %v938_v56 = vmul.f32 %v913_v39, %v844_v49 }
 0x415   :  { %v940_v57 = vmul.f32 %v921_v40, %v885_v50  ;;  %v846_v59 = vpop.f32.mrb[17].mxu0  ;;  %v887_v55 = vpop.f32.mrb[17].mxu1  ;;  %v1138_v60 = vpack.c.bf16 %v1375_v53, %v1371_v44 }
 0x416   :  { %v939_v61 = vmul.f32 %v917_v42, %v846_v59  ;;  %v941_v7 = vmul.f32 %v925_v43, %v887_v55  ;;  %v848_v62 = vpop.f32.mrb[18].mxu0  ;;  %v889_v63 = vpop.f32.mrb[18].mxu1  ;;  %v1066_v0 = vrot.slane %v1137_v54, %v1065_v45  ;;  %v988_v1 = vadd.f32 %v963_v46, %v938_v56 }
 0x417   :  { %v990_v3 = vadd.f32 %v971_v47, %v940_v57  ;;  %v849_v4 = vpop.f32.mrb[19].mxu0  ;;  %v890_v5 = vpop.f32.mrb[19].mxu1  ;;  %v1073_v6 = vrot.slane %v1138_v60, %v1065_v45 }
 0x418   :  { %v989_v8 = vadd.f32 %v967_v51, %v939_v61  ;;  %v991_v9 = vadd.f32 %v975_v52, %v941_v7  ;;  %v1133_v58 = vmul.f32 -1.442695, %v988_v1 }
 0x419   :  { %v1135_v10 = vmul.f32 -1.442695, %v990_v3  ;;  %v1088_v11 = vcombine.low %v1066_v0, %v1073_v6 }
 0x41a   :  { %v1134_v12 = vmul.f32 -1.442695, %v989_v8  ;;  %v1136_v13 = vmul.f32 -1.442695, %v991_v9  ;;  %1376 = vpow2.f32 %v1133_v58 }
 0x41b   :  { %1378 = vpow2.f32 %v1135_v10  ;;  %v1096_v31 = vrot.slane %v1088_v11, %v1065_v45 }
 0x41c   :  { %1380 = vpow2.f32 %v1134_v12 }
 0x41d   :  { %1382 = vpow2.f32 %v1136_v13 }
 0x424   :  { %v1377_v14 = vpop.eup %1376 }
 0x425   :  { %v1379_v15 = vpop.eup %1378  ;;  %v1020_v16 = vadd.f32 1.0, %v1377_v14 }
 0x426   :  { %v1381_v17 = vpop.eup %1380  ;;  %v1022_v18 = vadd.f32 1.0, %v1379_v15 }
 0x427   :  { %v1383_v19 = vpop.eup %1382  ;;  %1384 = vrcp.f32 %v1020_v16  ;;  %v1021_v20 = vadd.f32 1.0, %v1381_v17 }
 0x428   :  { %1386 = vrcp.f32 %v1022_v18  ;;  %v1023_v21 = vadd.f32 1.0, %v1383_v19 }
 0x429   :  { %1388 = vrcp.f32 %v1021_v20 }
 0x42a   :  { %1390 = vrcp.f32 %v1023_v21 }
 0x431   :  { %v1385_v22 = vpop.eup %1384 }
 0x432   :  { %v1387_v23 = vpop.eup %1386 }
 0x433   :  { %v1389_v24 = vpop.eup %1388 }
 0x434   :  { %v1391_v25 = vpop.eup %1390  ;;  %v1139_v26 = vpack.c.bf16 %v1389_v24, %v1385_v22 }
 0x435   :  { %v1140_v27 = vpack.c.bf16 %v1391_v25, %v1387_v23 }
 0x436   :  { %v1080_v28 = vrot.slane %v1139_v26, %v1065_v45 }
 0x437   :  { %v1087_v29 = vrot.slane %v1140_v27, %v1065_v45 }
 0x439   :  { %v1089_v30 = vcombine.low %v1080_v28, %v1087_v29 }
 0x43b   :  { %v1103_v32 = vrot.slane %v1089_v30, %v1065_v45 }
 0x43d   :  { %v1104_v33 = vcombine.low %v1096_v31, %v1103_v32 }
 0x43f   :  { %1106 = vst [vmem:[%s1750_s12] sm:$0xff] %v1104_v33 }
 0x440   :  { %1115 = vsyncpa [#allocation3], 1 }
 0x441   :  { %1116 = vsyncpa [#allocation5], 1 }

</bundles_post_ra>
